<compile_context>
chip_gen: v6e
topology: v6e:2x2x1
jax: 0.10.0
libtpu: 0.0.40
codegen_flags: <defaults>
</compile_context>

<pallas_src>
import functools

import jax
import jax.numpy as jnp
from jax.experimental import pallas as pl
from jax.experimental.pallas import tpu as pltpu

LANE = 128
_MIB = 1024 * 1024


def _round_up(x, m):
    return (x + m - 1) // m * m


def _vmem_capacity_bytes():
    try:
        return int(pltpu.get_tpu_info().vmem_capacity_bytes)
    except Exception:
        return 64 * _MIB  # conservative fallback (v7x per-TC VMEM)


def _decoder_kernel(emb_ref, w14_ref, b14_ref, w2_ref, b2_ref, w3_ref, b3_ref,
                    x_ref, adj_ref, *, h2p):
    # dropout is eval-mode identity.
    emb = emb_ref[...].astype(jnp.bfloat16)                                # (tm, H)

    # Fused linear1 | linear4 (shared LHS emb): one wide MXU push, f32 accumulation.
    h14 = jnp.dot(emb, w14_ref[...], preferred_element_type=jnp.float32)
    h14 = jnp.maximum(h14 + b14_ref[...], 0.0)                             # (tm, H2p+Ep)
    h1 = h14[:, :h2p]                                                      # relu(linear1(emb))
    adj = h14[:, h2p:]                                                     # relu(linear4(emb))

    h2 = jnp.dot(h1.astype(jnp.bfloat16), w2_ref[...],
                 preferred_element_type=jnp.float32)
    h2 = jnp.maximum(h2 + b2_ref[...], 0.0)                                # (tm, H2p)

    x = jnp.dot(h2.astype(jnp.bfloat16), w3_ref[...],
                preferred_element_type=jnp.float32)
    x = jnp.maximum(x + b3_ref[...], 0.0)                                  # (tm, Ep)

    x_ref[...] = x.astype(x_ref.dtype)
    adj_ref[...] = adj.astype(adj_ref.dtype)


def pack_decoder_params(params):
    """One-time parameter packing (hoisted out of the per-call path).

    Fuses [W1 | W4] so both heads share the embedding LHS, zero-pads every feature
    dim to a 128-lane multiple, and casts matmul weights to bf16 (biases stay f32).
    Padded weight/bias columns are exactly zero, so padded activations stay zero
    through the whole ReLU chain.
    """
    w1, b1, w2, b2, w3, b3, w4, b4 = params
    H, H2 = w1.shape
    E = w3.shape[1]
    H2p = _round_up(H2, LANE)
    Ep = _round_up(E, LANE)

    w14 = jnp.zeros((H, H2p + Ep), jnp.bfloat16)
    w14 = w14.at[:, :H2].set(w1.astype(jnp.bfloat16))
    w14 = w14.at[:, H2p:H2p + E].set(w4.astype(jnp.bfloat16))
    b14 = jnp.zeros((1, H2p + Ep), jnp.float32)
    b14 = b14.at[0, :H2].set(b1).at[0, H2p:H2p + E].set(b4)

    w2p = jnp.zeros((H2p, H2p), jnp.bfloat16).at[:H2, :H2].set(w2.astype(jnp.bfloat16))
    b2p = jnp.zeros((1, H2p), jnp.float32).at[0, :H2].set(b2)
    w3p = jnp.zeros((H2p, Ep), jnp.bfloat16).at[:H2, :E].set(w3.astype(jnp.bfloat16))
    b3p = jnp.zeros((1, Ep), jnp.float32).at[0, :E].set(b3)
    return (w14, b14, w2p, b2p, w3p, b3p)


@functools.partial(jax.jit,
                   static_argnames=("edge_size", "tile_m", "single_buffer_weights"))
def pre_embedded_graph_decoder(embedding, packed_params, *, edge_size,
                               tile_m=None, single_buffer_weights=True):
    """embedding: (B, N, H) float32.  Returns (x, adj), each (B, N, edge_size) float32."""
    w14, b14, w2p, b2p, w3p, b3p = packed_params
    B, N, H = embedding.shape
    H2p = w2p.shape[0]
    Ep = w3p.shape[1]
    E = edge_size
    M = B * N

    cap_bytes = _vmem_capacity_bytes()
    vmem_cap = (cap_bytes * 3) // 4          # headroom: ~96 MiB v5e/v6e, ~48 MiB v7x
    if tile_m is None:
        tile_m = 256 if cap_bytes <= 64 * _MIB else 512   # smaller default on v7x

    # Feed embedding rows directly (f32, unpadded): block last dim == full array dim is
    # exempt from the 128-lane rule; bf16 cast happens inside the kernel. No extra HBM
    # pad/cast pass.
    rows = embedding.reshape(M, H)
    M_rows = M
    if M < 8:                                # tiny-input fallback: keep row blocks >= 8
        rows = jnp.pad(rows, ((0, 8 - M), (0, 0)))
        M_rows = 8

    tm = min(_round_up(tile_m, 8), _round_up(M_rows, 8))
    if pl.cdiv(M_rows, tm) < 2 and M_rows > 8:
        # v7x megacore: give the parallel axis at least two steps so both TCs get work.
        tm = _round_up(pl.cdiv(M_rows, 2), 8)
    grid = (pl.cdiv(M_rows, tm),)

    weight_bytes = ((w14.size + w2p.size + w3p.size) * 2
                    + (b14.size + b2p.size + b3p.size) * 4)

    # Advisory cost estimate for XLA scheduling.
    flops = 2 * M * (H * (H2p + Ep) + H2p * H2p + H2p * Ep)
    bytes_accessed = M_rows * H * 4 + weight_bytes + M_rows * 2 * Ep * 4
    cost = pl.CostEstimate(flops=flops, transcendentals=0, bytes_accessed=bytes_accessed)

    # VMEM budget: (single-)buffered weights + double-buffered row/output blocks + live f32.
    wbuf = 1 if single_buffer_weights else 2
    io_bytes = 2 * (tm * H * 4 + 2 * tm * Ep * 4)
    live_f32 = tm * (2 * (H2p + Ep) + H2p + Ep) * 4 + tm * H * 2
    vmem_est = wbuf * weight_bytes + io_bytes + live_f32
    # Always pass the limit (+25% headroom): v5e's default scoped limit is only 16 MiB.
    vmem_limit = int(min(max(vmem_est * 5 // 4, 32 * _MIB), vmem_cap))
    # TODO(synk): if the single-buffered weight footprint approaches vmem_cap (large H,
    # esp. v7x's 64 MiB/TC), tile the weight K/N dims (pltpu.emit_pipeline or a trailing
    # "arbitrary" reduction axis + f32 accumulator) instead of keeping weights resident.

    pipeline_mode = pl.Buffered(1) if single_buffer_weights else None
    replicated = lambda shape: pl.BlockSpec(shape, lambda i: (0, 0),
                                            pipeline_mode=pipeline_mode)
    kernel = functools.partial(_decoder_kernel, h2p=H2p)

    x_pad, adj_pad = pl.pallas_call(
        kernel,
        out_shape=(jax.ShapeDtypeStruct((M_rows, Ep), jnp.float32),
                   jax.ShapeDtypeStruct((M_rows, Ep), jnp.float32)),
        grid_spec=pltpu.PrefetchScalarGridSpec(
            num_scalar_prefetch=0,
            grid=grid,
            in_specs=[
                pl.BlockSpec((tm, H), lambda i: (i, 0)),                  # embedding rows (f32)
                replicated((H, H2p + Ep)), replicated((1, H2p + Ep)),     # fused W1|W4 + bias
                replicated((H2p, H2p)),    replicated((1, H2p)),          # linear2
                replicated((H2p, Ep)),     replicated((1, Ep)),           # linear3
            ],
            out_specs=[pl.BlockSpec((tm, Ep), lambda i: (i, 0)),
                       pl.BlockSpec((tm, Ep), lambda i: (i, 0))],
        ),
        compiler_params=pltpu.CompilerParams(
            dimension_semantics=("parallel",),
            vmem_limit_bytes=vmem_limit),
        cost_estimate=cost,
    )(rows, w14, b14, w2p, b2p, w3p, b3p)

    # Fast path: if E is already a lane multiple (Ep == E) and M >= 8, these are free
    # reshapes with no slice copy; otherwise only the needed columns/rows are sliced.
    if M_rows != M:
        x_pad, adj_pad = x_pad[:M], adj_pad[:M]
    if Ep != E:
        x_pad, adj_pad = x_pad[:, :E], adj_pad[:, :E]
    return x_pad.reshape(B, N, E), adj_pad.reshape(B, N, E)


def run_decoder(embedding, packed_params, *, edge_size, tile_m=None):
    """Calls the kernel; falls back to double-buffered weights if this jax/libtpu build
    rejects pipeline_mode=pl.Buffered(1) on grid-invariant blocks."""
    try:
        return pre_embedded_graph_decoder(embedding, packed_params,
                                          edge_size=edge_size, tile_m=tile_m)
    except Exception:
        return pre_embedded_graph_decoder(embedding, packed_params,
                                          edge_size=edge_size, tile_m=tile_m,
                                          single_buffer_weights=False)


def init_params(key, hidden_size, edge_tsr_size):
    """Deterministic synthetic parameters (nn.Linear-style, stored (in, out))."""
    H, E, H2 = hidden_size, edge_tsr_size, 2 * hidden_size
    ks = jax.random.split(key, 8)
    scale = 0.05
    w1 = scale * jax.random.normal(ks[0], (H, H2), jnp.float32)
    b1 = scale * jax.random.normal(ks[1], (H2,), jnp.float32)
    w2 = scale * jax.random.normal(ks[2], (H2, H2), jnp.float32)
    b2 = scale * jax.random.normal(ks[3], (H2,), jnp.float32)
    w3 = scale * jax.random.normal(ks[4], (H2, E), jnp.float32)
    b3 = scale * jax.random.normal(ks[5], (E,), jnp.float32)
    w4 = scale * jax.random.normal(ks[6], (H, E), jnp.float32)
    b4 = scale * jax.random.normal(ks[7], (E,), jnp.float32)
    return (w1, b1, w2, b2, w3, b3, w4, b4)


def _reference(embedding, params):
    """Pure-JAX f32 reference for the correctness check."""
    w1, b1, w2, b2, w3, b3, w4, b4 = params
    emb = embedding  # dropout in eval mode is identity
    h = jax.nn.relu(emb @ w1 + b1)
    h = jax.nn.relu(h @ w2 + b2)
    x = jax.nn.relu(h @ w3 + b3)
    adj = jax.nn.relu(emb @ w4 + b4)
    return x, adj


if __name__ == "__main__":
    key = jax.random.PRNGKey(0)
    k_emb, k_par, k_emb2, k_par2 = jax.random.split(key, 4)

    # Config 1: unaligned edge size (lane-padded output path).
    B, N, H, E = 2, 8, 32, 16   # batch, nodes, hidden_size, edge_tsr_size
    embedding = jax.random.normal(k_emb, (B, N, H), jnp.float32)
    params = init_params(k_par, H, E)
    packed = pack_decoder_params(params)

    x, adj = run_decoder(embedding, packed, edge_size=E)
    jax.block_until_ready((x, adj))

    x_ref, adj_ref = _reference(embedding, params)
    assert x.shape == (B, N, E) and adj.shape == (B, N, E)
    # bf16 MXU inputs with f32 accumulation -> modest tolerance vs. the f32 reference.
    assert jnp.allclose(x, x_ref, atol=3e-2, rtol=3e-2), "x mismatch (E=16)"
    assert jnp.allclose(adj, adj_ref, atol=3e-2, rtol=3e-2), "adj mismatch (E=16)"

    # Config 2: lane-aligned edge size (slice-free output fast path).
    E2 = 128
    embedding2 = jax.random.normal(k_emb2, (B, N, H), jnp.float32)
    params2 = init_params(k_par2, H, E2)
    packed2 = pack_decoder_params(params2)

    x2, adj2 = run_decoder(embedding2, packed2, edge_size=E2)
    jax.block_until_ready((x2, adj2))

    x2_ref, adj2_ref = _reference(embedding2, params2)
    assert x2.shape == (B, N, E2) and adj2.shape == (B, N, E2)
    assert jnp.allclose(x2, x2_ref, atol=3e-2, rtol=3e-2), "x mismatch (E=128)"
    assert jnp.allclose(adj2, adj2_ref, atol=3e-2, rtol=3e-2), "adj mismatch (E=128)"

    print("KERNEL_OK")
</pallas_src>

<mosaic_0001>
module attributes {stable_mosaic.version = 11 : i64} {
  func.func @_decoder_kernel(%arg0: i32, %arg1: memref<8x32xf32, #tpu.memory_space<vmem>>, %arg2: memref<32x256xbf16, #tpu.memory_space<vmem>>, %arg3: memref<1x256xf32, #tpu.memory_space<vmem>>, %arg4: memref<128x128xbf16, #tpu.memory_space<vmem>>, %arg5: memref<1x128xf32, #tpu.memory_space<vmem>>, %arg6: memref<128x128xbf16, #tpu.memory_space<vmem>>, %arg7: memref<1x128xf32, #tpu.memory_space<vmem>>, %arg8: memref<8x128xf32, #tpu.memory_space<vmem>>, %arg9: memref<8x128xf32, #tpu.memory_space<vmem>>) attributes {dimension_semantics = [#tpu.dimension_semantics<parallel>], iteration_bounds = array<i64: 2>, scalar_prefetch = 0 : i64, scratch_operands = 0 : i64, tpu.core_type = #tpu.core_type<tc>, window_params = [{transform_indices = @transform_0, window_bounds = array<i64: 8, 32>}, {pipeline_mode = #tpu.pipeline_mode<synchronous>, transform_indices = @transform_1, window_bounds = array<i64: 32, 256>}, {pipeline_mode = #tpu.pipeline_mode<synchronous>, transform_indices = @transform_2, window_bounds = array<i64: 1, 256>}, {pipeline_mode = #tpu.pipeline_mode<synchronous>, transform_indices = @transform_3, window_bounds = array<i64: 128, 128>}, {pipeline_mode = #tpu.pipeline_mode<synchronous>, transform_indices = @transform_4, window_bounds = array<i64: 1, 128>}, {pipeline_mode = #tpu.pipeline_mode<synchronous>, transform_indices = @transform_5, window_bounds = array<i64: 128, 128>}, {pipeline_mode = #tpu.pipeline_mode<synchronous>, transform_indices = @transform_6, window_bounds = array<i64: 1, 128>}, {transform_indices = @transform_7, window_bounds = array<i64: 8, 128>}, {transform_indices = @transform_8, window_bounds = array<i64: 8, 128>}]} {
    %c0 = arith.constant 0 : index
    %c0_0 = arith.constant 0 : index
    %0 = vector.load %arg1[%c0, %c0_0] : memref<8x32xf32, #tpu.memory_space<vmem>>, vector<8x32xf32>
    %1 = arith.truncf %0 : vector<8x32xf32> to vector<8x32xbf16>
    %c0_1 = arith.constant 0 : index
    %c0_2 = arith.constant 0 : index
    %2 = vector.load %arg2[%c0_1, %c0_2] : memref<32x256xbf16, #tpu.memory_space<vmem>>, vector<32x256xbf16>
    %cst = arith.constant dense<0.000000e+00> : vector<8x256xf32>
    %3 = tpu.matmul %1, %2, %cst {dimension_numbers = #tpu.dot_dimension_numbers<[1], [0], [0], [1], [0, 0, 1, 1], [], []>} : vector<8x32xbf16>, vector<32x256xbf16>, vector<8x256xf32> -> vector<8x256xf32>
    %c0_3 = arith.constant 0 : index
    %c0_4 = arith.constant 0 : index
    %4 = vector.load %arg3[%c0_3, %c0_4] : memref<1x256xf32, #tpu.memory_space<vmem>>, vector<1x256xf32>
    %5 = vector.broadcast %4 : vector<1x256xf32> to vector<8x256xf32>
    %6 = arith.addf %3, %5 : vector<8x256xf32>
    %cst_5 = arith.constant 0.000000e+00 : f32
    %7 = vector.broadcast %cst_5 : f32 to vector<8x256xf32>
    %8 = arith.maximumf %6, %7 : vector<8x256xf32>
    %9 = vector.extract_strided_slice %8 {offsets = [0, 0], sizes = [8, 128], strides = [1, 1]} : vector<8x256xf32> to vector<8x128xf32>
    %10 = vector.extract_strided_slice %8 {offsets = [0, 128], sizes = [8, 128], strides = [1, 1]} : vector<8x256xf32> to vector<8x128xf32>
    %11 = arith.truncf %9 : vector<8x128xf32> to vector<8x128xbf16>
    %c0_6 = arith.constant 0 : index
    %c0_7 = arith.constant 0 : index
    %12 = vector.load %arg4[%c0_6, %c0_7] : memref<128x128xbf16, #tpu.memory_space<vmem>>, vector<128x128xbf16>
    %cst_8 = arith.constant dense<0.000000e+00> : vector<8x128xf32>
    %13 = tpu.matmul %11, %12, %cst_8 {dimension_numbers = #tpu.dot_dimension_numbers<[1], [0], [0], [1], [0, 0, 1, 1], [], []>} : vector<8x128xbf16>, vector<128x128xbf16>, vector<8x128xf32> -> vector<8x128xf32>
    %c0_9 = arith.constant 0 : index
    %c0_10 = arith.constant 0 : index
    %14 = vector.load %arg5[%c0_9, %c0_10] : memref<1x128xf32, #tpu.memory_space<vmem>>, vector<1x128xf32>
    %15 = vector.broadcast %14 : vector<1x128xf32> to vector<8x128xf32>
    %16 = arith.addf %13, %15 : vector<8x128xf32>
    %cst_11 = arith.constant 0.000000e+00 : f32
    %17 = vector.broadcast %cst_11 : f32 to vector<8x128xf32>
    %18 = arith.maximumf %16, %17 : vector<8x128xf32>
    %19 = arith.truncf %18 : vector<8x128xf32> to vector<8x128xbf16>
    %c0_12 = arith.constant 0 : index
    %c0_13 = arith.constant 0 : index
    %20 = vector.load %arg6[%c0_12, %c0_13] : memref<128x128xbf16, #tpu.memory_space<vmem>>, vector<128x128xbf16>
    %cst_14 = arith.constant dense<0.000000e+00> : vector<8x128xf32>
    %21 = tpu.matmul %19, %20, %cst_14 {dimension_numbers = #tpu.dot_dimension_numbers<[1], [0], [0], [1], [0, 0, 1, 1], [], []>} : vector<8x128xbf16>, vector<128x128xbf16>, vector<8x128xf32> -> vector<8x128xf32>
    %c0_15 = arith.constant 0 : index
    %c0_16 = arith.constant 0 : index
    %22 = vector.load %arg7[%c0_15, %c0_16] : memref<1x128xf32, #tpu.memory_space<vmem>>, vector<1x128xf32>
    %23 = vector.broadcast %22 : vector<1x128xf32> to vector<8x128xf32>
    %24 = arith.addf %21, %23 : vector<8x128xf32>
    %cst_17 = arith.constant 0.000000e+00 : f32
    %25 = vector.broadcast %cst_17 : f32 to vector<8x128xf32>
    %26 = arith.maximumf %24, %25 : vector<8x128xf32>
    %c0_18 = arith.constant 0 : index
    %c0_19 = arith.constant 0 : index
    %27 = vector.load %arg8[%c0_18, %c0_19] : memref<8x128xf32, #tpu.memory_space<vmem>>, vector<8x128xf32>
    tpu.vector_store %arg8[%c0_18, %c0_19], %26 {strides = array<i32>} : memref<8x128xf32, #tpu.memory_space<vmem>>, vector<8x128xf32>,
    %c0_20 = arith.constant 0 : index
    %c0_21 = arith.constant 0 : index
    %28 = vector.load %arg9[%c0_20, %c0_21] : memref<8x128xf32, #tpu.memory_space<vmem>>, vector<8x128xf32>
    tpu.vector_store %arg9[%c0_20, %c0_21], %10 {strides = array<i32>} : memref<8x128xf32, #tpu.memory_space<vmem>>, vector<8x128xf32>,
    return
  }
  func.func @transform_0(%arg0: i32) -> (i32, i32) {
    %c0_i32 = arith.constant 0 : i32
    %c0_i32_0 = arith.constant 0 : i32
    return %arg0, %c0_i32 : i32, i32
  }
  func.func @transform_1(%arg0: i32) -> (i32, i32) {
    %c0_i32 = arith.constant 0 : i32
    %c0_i32_0 = arith.constant 0 : i32
    %c0_i32_1 = arith.constant 0 : i32
    return %c0_i32, %c0_i32_0 : i32, i32
  }
  func.func @transform_2(%arg0: i32) -> (i32, i32) {
    %c0_i32 = arith.constant 0 : i32
    %c0_i32_0 = arith.constant 0 : i32
    %c0_i32_1 = arith.constant 0 : i32
    return %c0_i32, %c0_i32_0 : i32, i32
  }
  func.func @transform_3(%arg0: i32) -> (i32, i32) {
    %c0_i32 = arith.constant 0 : i32
    %c0_i32_0 = arith.constant 0 : i32
    %c0_i32_1 = arith.constant 0 : i32
    return %c0_i32, %c0_i32_0 : i32, i32
  }
  func.func @transform_4(%arg0: i32) -> (i32, i32) {
    %c0_i32 = arith.constant 0 : i32
    %c0_i32_0 = arith.constant 0 : i32
    %c0_i32_1 = arith.constant 0 : i32
    return %c0_i32, %c0_i32_0 : i32, i32
  }
  func.func @transform_5(%arg0: i32) -> (i32, i32) {
    %c0_i32 = arith.constant 0 : i32
    %c0_i32_0 = arith.constant 0 : i32
    %c0_i32_1 = arith.constant 0 : i32
    return %c0_i32, %c0_i32_0 : i32, i32
  }
  func.func @transform_6(%arg0: i32) -> (i32, i32) {
    %c0_i32 = arith.constant 0 : i32
    %c0_i32_0 = arith.constant 0 : i32
    %c0_i32_1 = arith.constant 0 : i32
    return %c0_i32, %c0_i32_0 : i32, i32
  }
  func.func @transform_7(%arg0: i32) -> (i32, i32) {
    %c0_i32 = arith.constant 0 : i32
    %c0_i32_0 = arith.constant 0 : i32
    return %arg0, %c0_i32 : i32, i32
  }
  func.func @transform_8(%arg0: i32) -> (i32, i32) {
    %c0_i32 = arith.constant 0 : i32
    %c0_i32_0 = arith.constant 0 : i32
    return %arg0, %c0_i32 : i32, i32
  }
}

module attributes {stable_mosaic.version = 11 : i64} {
  func.func @_decoder_kernel(%arg0: i32, %arg1: memref<8x32xf32, #tpu.memory_space<vmem>>, %arg2: memref<32x256xbf16, #tpu.memory_space<vmem>>, %arg3: memref<1x256xf32, #tpu.memory_space<vmem>>, %arg4: memref<128x128xbf16, #tpu.memory_space<vmem>>, %arg5: memref<1x128xf32, #tpu.memory_space<vmem>>, %arg6: memref<128x128xbf16, #tpu.memory_space<vmem>>, %arg7: memref<1x128xf32, #tpu.memory_space<vmem>>, %arg8: memref<8x128xf32, #tpu.memory_space<vmem>>, %arg9: memref<8x128xf32, #tpu.memory_space<vmem>>) attributes {dimension_semantics = [#tpu.dimension_semantics<parallel>], iteration_bounds = array<i64: 2>, scalar_prefetch = 0 : i64, scratch_operands = 0 : i64, tpu.core_type = #tpu.core_type<tc>, window_params = [{transform_indices = @transform_0, window_bounds = array<i64: 8, 32>}, {pipeline_mode = #tpu.pipeline_mode<synchronous>, transform_indices = @transform_1, window_bounds = array<i64: 32, 256>}, {pipeline_mode = #tpu.pipeline_mode<synchronous>, transform_indices = @transform_2, window_bounds = array<i64: 1, 256>}, {pipeline_mode = #tpu.pipeline_mode<synchronous>, transform_indices = @transform_3, window_bounds = array<i64: 128, 128>}, {pipeline_mode = #tpu.pipeline_mode<synchronous>, transform_indices = @transform_4, window_bounds = array<i64: 1, 128>}, {pipeline_mode = #tpu.pipeline_mode<synchronous>, transform_indices = @transform_5, window_bounds = array<i64: 128, 128>}, {pipeline_mode = #tpu.pipeline_mode<synchronous>, transform_indices = @transform_6, window_bounds = array<i64: 1, 128>}, {transform_indices = @transform_7, window_bounds = array<i64: 8, 128>}, {transform_indices = @transform_8, window_bounds = array<i64: 8, 128>}]} {
    %c0 = arith.constant 0 : index
    %c0_0 = arith.constant 0 : index
    %0 = vector.load %arg1[%c0, %c0_0] : memref<8x32xf32, #tpu.memory_space<vmem>>, vector<8x32xf32>
    %1 = arith.truncf %0 : vector<8x32xf32> to vector<8x32xbf16>
    %c0_1 = arith.constant 0 : index
    %c0_2 = arith.constant 0 : index
    %2 = vector.load %arg2[%c0_1, %c0_2] : memref<32x256xbf16, #tpu.memory_space<vmem>>, vector<32x256xbf16>
    %cst = arith.constant dense<0.000000e+00> : vector<8x256xf32>
    %3 = tpu.matmul %1, %2, %cst {dimension_numbers = #tpu.dot_dimension_numbers<[1], [0], [0], [1], [0, 0, 1, 1], [], []>} : vector<8x32xbf16>, vector<32x256xbf16>, vector<8x256xf32> -> vector<8x256xf32>
    %c0_3 = arith.constant 0 : index
    %c0_4 = arith.constant 0 : index
    %4 = vector.load %arg3[%c0_3, %c0_4] : memref<1x256xf32, #tpu.memory_space<vmem>>, vector<1x256xf32>
    %5 = vector.broadcast %4 : vector<1x256xf32> to vector<8x256xf32>
    %6 = arith.addf %3, %5 : vector<8x256xf32>
    %cst_5 = arith.constant 0.000000e+00 : f32
    %7 = vector.broadcast %cst_5 : f32 to vector<8x256xf32>
    %8 = arith.maximumf %6, %7 : vector<8x256xf32>
    %9 = vector.extract_strided_slice %8 {offsets = [0, 0], sizes = [8, 128], strides = [1, 1]} : vector<8x256xf32> to vector<8x128xf32>
    %10 = vector.extract_strided_slice %8 {offsets = [0, 128], sizes = [8, 128], strides = [1, 1]} : vector<8x256xf32> to vector<8x128xf32>
    %11 = arith.truncf %9 : vector<8x128xf32> to vector<8x128xbf16>
    %c0_6 = arith.constant 0 : index
    %c0_7 = arith.constant 0 : index
    %12 = vector.load %arg4[%c0_6, %c0_7] : memref<128x128xbf16, #tpu.memory_space<vmem>>, vector<128x128xbf16>
    %cst_8 = arith.constant dense<0.000000e+00> : vector<8x128xf32>
    %13 = tpu.matmul %11, %12, %cst_8 {dimension_numbers = #tpu.dot_dimension_numbers<[1], [0], [0], [1], [0, 0, 1, 1], [], []>} : vector<8x128xbf16>, vector<128x128xbf16>, vector<8x128xf32> -> vector<8x128xf32>
    %c0_9 = arith.constant 0 : index
    %c0_10 = arith.constant 0 : index
    %14 = vector.load %arg5[%c0_9, %c0_10] : memref<1x128xf32, #tpu.memory_space<vmem>>, vector<1x128xf32>
    %15 = vector.broadcast %14 : vector<1x128xf32> to vector<8x128xf32>
    %16 = arith.addf %13, %15 : vector<8x128xf32>
    %cst_11 = arith.constant 0.000000e+00 : f32
    %17 = vector.broadcast %cst_11 : f32 to vector<8x128xf32>
    %18 = arith.maximumf %16, %17 : vector<8x128xf32>
    %19 = arith.truncf %18 : vector<8x128xf32> to vector<8x128xbf16>
    %c0_12 = arith.constant 0 : index
    %c0_13 = arith.constant 0 : index
    %20 = vector.load %arg6[%c0_12, %c0_13] : memref<128x128xbf16, #tpu.memory_space<vmem>>, vector<128x128xbf16>
    %cst_14 = arith.constant dense<0.000000e+00> : vector<8x128xf32>
    %21 = tpu.matmul %19, %20, %cst_14 {dimension_numbers = #tpu.dot_dimension_numbers<[1], [0], [0], [1], [0, 0, 1, 1], [], []>} : vector<8x128xbf16>, vector<128x128xbf16>, vector<8x128xf32> -> vector<8x128xf32>
    %c0_15 = arith.constant 0 : index
    %c0_16 = arith.constant 0 : index
    %22 = vector.load %arg7[%c0_15, %c0_16] : memref<1x128xf32, #tpu.memory_space<vmem>>, vector<1x128xf32>
    %23 = vector.broadcast %22 : vector<1x128xf32> to vector<8x128xf32>
    %24 = arith.addf %21, %23 : vector<8x128xf32>
    %cst_17 = arith.constant 0.000000e+00 : f32
    %25 = vector.broadcast %cst_17 : f32 to vector<8x128xf32>
    %26 = arith.maximumf %24, %25 : vector<8x128xf32>
    %c0_18 = arith.constant 0 : index
    %c0_19 = arith.constant 0 : index
    %27 = vector.load %arg8[%c0_18, %c0_19] : memref<8x128xf32, #tpu.memory_space<vmem>>, vector<8x128xf32>
    tpu.vector_store %arg8[%c0_18, %c0_19], %26 {strides = array<i32>} : memref<8x128xf32, #tpu.memory_space<vmem>>, vector<8x128xf32>,
    %c0_20 = arith.constant 0 : index
    %c0_21 = arith.constant 0 : index
    %28 = vector.load %arg9[%c0_20, %c0_21] : memref<8x128xf32, #tpu.memory_space<vmem>>, vector<8x128xf32>
    tpu.vector_store %arg9[%c0_20, %c0_21], %10 {strides = array<i32>} : memref<8x128xf32, #tpu.memory_space<vmem>>, vector<8x128xf32>,
    return
  }
  func.func @transform_0(%arg0: i32) -> (i32, i32) {
    %c0_i32 = arith.constant 0 : i32
    %c0_i32_0 = arith.constant 0 : i32
    return %arg0, %c0_i32 : i32, i32
  }
  func.func @transform_1(%arg0: i32) -> (i32, i32) {
    %c0_i32 = arith.constant 0 : i32
    %c0_i32_0 = arith.constant 0 : i32
    %c0_i32_1 = arith.constant 0 : i32
    return %c0_i32, %c0_i32_0 : i32, i32
  }
  func.func @transform_2(%arg0: i32) -> (i32, i32) {
    %c0_i32 = arith.constant 0 : i32
    %c0_i32_0 = arith.constant 0 : i32
    %c0_i32_1 = arith.constant 0 : i32
    return %c0_i32, %c0_i32_0 : i32, i32
  }
  func.func @transform_3(%arg0: i32) -> (i32, i32) {
    %c0_i32 = arith.constant 0 : i32
    %c0_i32_0 = arith.constant 0 : i32
    %c0_i32_1 = arith.constant 0 : i32
    return %c0_i32, %c0_i32_0 : i32, i32
  }
  func.func @transform_4(%arg0: i32) -> (i32, i32) {
    %c0_i32 = arith.constant 0 : i32
    %c0_i32_0 = arith.constant 0 : i32
    %c0_i32_1 = arith.constant 0 : i32
    return %c0_i32, %c0_i32_0 : i32, i32
  }
  func.func @transform_5(%arg0: i32) -> (i32, i32) {
    %c0_i32 = arith.constant 0 : i32
    %c0_i32_0 = arith.constant 0 : i32
    %c0_i32_1 = arith.constant 0 : i32
    return %c0_i32, %c0_i32_0 : i32, i32
  }
  func.func @transform_6(%arg0: i32) -> (i32, i32) {
    %c0_i32 = arith.constant 0 : i32
    %c0_i32_0 = arith.constant 0 : i32
    %c0_i32_1 = arith.constant 0 : i32
    return %c0_i32, %c0_i32_0 : i32, i32
  }
  func.func @transform_7(%arg0: i32) -> (i32, i32) {
    %c0_i32 = arith.constant 0 : i32
    %c0_i32_0 = arith.constant 0 : i32
    return %arg0, %c0_i32 : i32, i32
  }
  func.func @transform_8(%arg0: i32) -> (i32, i32) {
    %c0_i32 = arith.constant 0 : i32
    %c0_i32_0 = arith.constant 0 : i32
    return %arg0, %c0_i32 : i32, i32
  }
}

</mosaic_0001>

<bundles_post_ra>
// kernel: pre_embedded_graph_decoder.1
= control target key start
LH: loop header
LB: loop body
LE: loop exit
PB: predicated region body
PF: predicated region fallthrough
CT: control target
= control target key end

     0   :  { %14 = vsyncpa [#allocation3], 0  ;;  %s1391_s0 = inlined_call_operand.hbm [shape: f32[16,32], index: 0, kind: input, shape index: {}]   ;;  %s1392_s1 = inlined_call_operand.hbm [shape: bf16[32,256], index: 1, kind: input, shape index: {}]   ;;  %s1393_s2 = inlined_call_operand.vmem [shape: f32[1,256], index: 2, kind: input, shape index: {}]   ;;  %s1394_s3 = inlined_call_operand.hbm [shape: bf16[128,128], index: 3, kind: input, shape index: {}]   ;;  %s1395_s4 = inlined_call_operand.vmem [shape: f32[1,128], index: 4, kind: input, shape index: {}]   ;;  %s1396_s5 = inlined_call_operand.hbm [shape: bf16[128,128], index: 5, kind: input, shape index: {}]   ;;  %s1397_s6 = inlined_call_operand.vmem [shape: f32[1,128], index: 6, kind: input, shape index: {}]   ;;  %s1398_s7 = inlined_call_operand.vmem [shape: f32[16,128], index: 7, kind: output, shape index: {0}]   ;;  %s1399_s8 = inlined_call_operand.vmem [shape: f32[16,128], index: 8, kind: output, shape index: {1}]  }
   0x1   :  { %16 = vsyncpa [#allocation3 + $0x1], 0 }
   0x2   :  { %17 = vsyncpa [#allocation5], 0 }
   0x3   :  { %18 = vsyncpa [#allocation8], 0  ;;  %s1218_s27 = smov 0   ;;  %s1220_s28 = smov 0  }
   0x4   :  { %s1222_s29 = smov 0   ;;  %s1224_s30 = smov 0  }
   0x5 LB: > { %s1237_s9 = sadd.s32 4294967295, %s1160_s30   ;;  %p44_p0 = scmp.ne.s32.totalorder %s1152_s28, %s1148_s27  ;;  %s1160_s30 = sphi %s1224_s30, %s1416_s30   ;;  %s1156_s29 = sphi %s1222_s29, %s1415_s29   ;;  %s1152_s28 = sphi %s1220_s28, %s1414_s28   ;;  %s1148_s27 = sphi %s1218_s27, %s1413_s27  }
   0x6   : > { %p1400_p1 = scmp.eq.s32.totalorder %s1237_s9, 0  ;;  %p816_p2 = scmp.ge.s32.totalorder %s1160_s30, 1 }
   0x7   : > { %p233_p3 = scmp.lt.s32.totalorder %s1160_s30, 3  ;;  %s1162_s12 = smov [#allocation4]  }
   0x8   : > { %p1245_p4 = por %p1400_p1, %p44_p0  ;;  %s245_s13 = sshll.u32 %s1162_s12, 4  ;;  %s246_s13 = int_to_ptr.vmem [resolvable:$true] %s245_s13 }
   0x9   : > { %p1249_p5 = pnand %p816_p2, %p233_p3  ;;  %s1163_s15 = smov [#allocation6]  }
   0xa   : > { %s1403_s10 = scalar_select %p1245_p4, 1, 0 }
   0xb   : > { %s1404_s11 = scalar_select %p1249_p5, 1, 0 }
   0xc   : > { %p927_p6 = pneg %p1249_p5  ;;  %s261_s16 = sshll.u32 %s1163_s15, 4  ;;  %s262_s16 = int_to_ptr.vmem [resolvable:$true] %s261_s16 }
   0xd   : > { %s1023_s17 = scalar_lea.vmem %s246_s13, 512  ;;  %p1031_p12 = scmp.lt.s32.totalorder %s246_s13, %s246_s13 }
   0xe   : > { %p1257_p7 = pnand %p927_p6, %p1400_p1  ;;  %p1024_p9 = scmp.ne.s32.totalorder %s246_s13, %s1023_s17 }
   0xf   : > { %p1032_p13 = scmp.lt.s32.totalorder %s1023_s17, %s1023_s17 }
  0x10   : > { %p1014_p8 = pneg %p1257_p7 }
  0x11   : > { %p1033_p0 = por %p1032_p13, %p1031_p12 }
  0x12   : > { %p1026_p10 = pnand %p1024_p9, %p1014_p8 }
  0x14   : > { %p1027_p11 = pneg %p1026_p10 }
  0x16   : > { %p1034_p2 = pnand %p1033_p0, %p1027_p11 }
  0x18   : > { %1037 = shalt.err (!%p1034_p2)
}
  0x19   : > { %s1164_s18 = smov 128   ;;  %s1165_s19 = smov 8  }
  0x1a   : > { %930 = dma.hbm_to_vmem [thread:$0]  (!%p1257_p7), %s1392_s1, 512, %s246_s13, [#allocation5], %s1164_s18, %s1164_s18, %s1165_s19  }
  0x1b   : > { %s1049_s22 = scalar_lea.vmem %s262_s16, 1024  ;;  %p1057_p10 = scmp.lt.s32.totalorder %s262_s16, %s262_s16 }
  0x1c   : > { %p1050_p3 = scmp.ne.s32.totalorder %s262_s16, %s1049_s22  ;;  %p1058_p1 = scmp.lt.s32.totalorder %s1049_s22, %s1049_s22 }
  0x1e   : > { %p1052_p6 = pnand %p1050_p3, %p1014_p8  ;;  %p1059_p12 = por %p1058_p1, %p1057_p10 }
  0x20   : > { %p1053_p9 = pneg %p1052_p6 }
  0x22   : > { %p1060_p11 = pnand %p1059_p12, %p1053_p9 }
  0x24   : > { %1063 = shalt.err (!%p1060_p11)
}
  0x25   : > { %s1166_s23 = smov 64   ;;  %s1167_s24 = smov 4  }
  0x26   : > { %933 = dma.hbm_to_vmem [thread:$0]  (!%p1257_p7), %s1394_s3, 1024, %s262_s16, [#allocation5], %s1166_s23, %s1166_s23, %s1167_s24  }
  0x27   : > { %s1168_s27 = smov [#allocation7]   ;;  %s1280_s13 = sadd.s32 1, %s1160_s30  }
  0x28   : > { %s277_s12 = sshll.u32 %s1168_s27, 4  ;;  %s278_s12 = int_to_ptr.vmem [resolvable:$true] %s277_s12 }
  0x29   : > { %s1075_s15 = scalar_lea.vmem %s278_s12, 1024  ;;  %p1083_p2 = scmp.lt.s32.totalorder %s278_s12, %s278_s12 }
  0x2a   : > { %p1076_p13 = scmp.ne.s32.totalorder %s278_s12, %s1075_s15  ;;  %p1084_p3 = scmp.lt.s32.totalorder %s1075_s15, %s1075_s15 }
  0x2c   : > { %p1078_p1 = pnand %p1076_p13, %p1014_p8  ;;  %p1085_p6 = por %p1084_p3, %p1083_p2 }
  0x2e   : > { %p1079_p0 = pneg %p1078_p1 }
  0x30   : > { %p1086_p9 = pnand %p1085_p6, %p1079_p0 }
  0x32   : > { %1089 = shalt.err (!%p1086_p9)
}
  0x33   : > { %936 = dma.hbm_to_vmem [thread:$0]  (!%p1257_p7), %s1396_s5, 1024, %s278_s12, [#allocation8], %s1166_s23, %s1166_s23, %s1167_s24  }
  0x34   : > { %s28_s18 = ssub.s32 %s1160_s30, %s1280_s13  ;;  %s31_s19 = sadd.s32 1, %s1156_s29 }
  0x35   : > { %p29_p8 = scmp.eq.s32.totalorder %s28_s18, 0  ;;  %p38_p10 = scmp.ne.s32.totalorder %s1156_s29, %s1152_s28 }
  0x36   : > { %p39_p12 = scmp.eq.s32.totalorder %s1160_s30, 0  ;;  %p944_p11 = scmp.lt.s32.totalorder %s1160_s30, 2 }
  0x37   : > { %s1298_s14 = scalar_select %p29_p8, %s1156_s29, %s31_s19  }
  0x38   : > { %p40_p13 = por %p39_p12, %p38_p10  ;;  %s294_s20 = sand.u32 1, %s1156_s29  }
  0x39   : > { %s821_s21 = sshll.u32 %s294_s20, 3  ;;  %s822_s22 = sshll.u32 %s1160_s30, 7 }
  0x3a   : > { %s1305_s27 = scalar_lea.hbm %s1391_s0, %s822_s22  ;;  %s298_s23 = scalar_lea.vmem [#allocation2], %s821_s21 }
  0x3b   : > { %s305_s24 = sshll.u32 %s298_s23, 4  ;;  %p1307_p7 = pnand %p944_p11, %p40_p13  ;;  %s306_s24 = int_to_ptr.vmem [resolvable:$true] %s305_s24 }
  0x3c   : > { %s295_s15 = scalar_lea.sflag [#allocation3], %s294_s20  ;;  %s1090_s17 = scalar_lea.hbm %s1305_s27, 128 }
  0x3d   : > { %p1091_p1 = scmp.ne.s32.totalorder %s1305_s27, %s1090_s17  ;;  %p1092_p0 = pneg %p1307_p7 }
  0x3e   : > { %s1095_s18 = scalar_lea.hbm %s1391_s0, 256  ;;  %p1096_p6 = scmp.lt.s32.totalorder %s1305_s27, %s1391_s0 }
  0x3f   : > { %p1093_p2 = pnand %p1092_p0, %p1091_p1  ;;  %p1097_p9 = scmp.lt.s32.totalorder %s1095_s18, %s1090_s17 }
  0x41   : > { %p1094_p3 = pneg %p1093_p2  ;;  %p1098_p8 = por %p1097_p9, %p1096_p6 }
  0x43   : > { %p1099_p10 = pnand %p1098_p8, %p1094_p3 }
  0x45   : > { %1102 = shalt.err (!%p1099_p10)
}
  0x46   : > { %s1103_s22 = scalar_lea.vmem %s306_s24, 128  ;;  %s1169_s20 = smov [#allocation2]  }
  0x47   : > { %p1104_p12 = scmp.ne.s32.totalorder %s306_s24, %s1103_s22  ;;  %s1108_s25 = sshll.u32 %s1169_s20, 4  ;;  %s1109_s25 = int_to_ptr.vmem [resolvable:$false] %s1108_s25 }
  0x48   : > { %s1110_s26 = scalar_lea.vmem %s1109_s25, 256  ;;  %p1111_p1 = scmp.lt.s32.totalorder %s306_s24, %s1109_s25 }
  0x49   : > { %p1106_p11 = pnand %p1104_p12, %p1092_p0  ;;  %p1112_p2 = scmp.lt.s32.totalorder %s1110_s26, %s1103_s22 }
  0x4b   : > { %p1107_p13 = pneg %p1106_p11  ;;  %p1113_p4 = por %p1112_p2, %p1111_p1 }
  0x4d   : > { %p1114_p5 = pnand %p1113_p4, %p1107_p13 }
  0x4f   : > { %1117 = shalt.err (!%p1114_p5)
}
  0x50   : > { %940 = dma.hbm_to_vmem [thread:$0]  (!%p1307_p7), %s1305_s27, 128, %s306_s24, %s295_s15  }
  0x51   : > { %p1407_p3 = scmp.ne.s32.totalorder %s1404_s11, 0 }
  0x52   : > { %s316_s23 = sand.u32 (!%p1407_p3), 1, %s1152_s28   ;;  %p1408_p0 = scmp.ne.s32.totalorder (!%p1407_p3), %s1403_s10, 0 }
  0x53   : > { %314 = sbr.rel (%p1407_p3) target bundleno = 702 (0x2be), region = 48  ;;  %s824_s17 = sshll.u32 (!%p1407_p3), %s316_s23, 3 }
  0x54   : > { %s317_s30 = scalar_lea.sflag (!%p1407_p3), [#allocation3], %s316_s23  ;;  %s320_s16 = scalar_lea.vmem (!%p1407_p3), [#allocation2], %s824_s17 }
  0x58   : > { %1135 = dma.done.wait (%p1408_p0), %s317_s30, 128  }
  0x59   : > { %1137 = vsyncadd (%p1408_p0), %s317_s30, 4294967168  ;;  %p1409_p4 = scmp.eq.s32.totalorder %s1237_s9, 0 }
  0x5b   : > { %1139 = dma.done.wait (%p1409_p4), [#allocation5], 1536   ;;  %p1410_p5 = pmov %p1409_p4 }
  0x5c   : > { %p1411_p7 = pmov %p1409_p4 }
  0x5d   : > { %1141 = vsyncadd (%p1410_p5), [#allocation5], 4294965760 }
  0x5e   : > { %1143 = dma.done.wait (%p1411_p7), [#allocation8], 1024   ;;  %p1412_p6 = pmov %p1409_p4 }
  0x5f   : > { %v1170_v0 = vmov 0   ;;  %v1171_v1 = vmov 0.0   ;;  %v990_v2 = vld [vmem:[#allocation4 + $0x14] ss:$8 sps:$4 sm:$0xff]   ;;  %v992_v3 = vld [vmem:[#allocation4 + $0x10] ss:$8 sps:$4 sm:$0xff]   ;;  %v385_v22 = vlaneseq }
  0x60   : > { %1145 = vsyncadd (%p1412_p6), [#allocation8], 4294966272  ;;  %451 = vmatprep.mubr.bf16.mxu0 %v1170_v0  ;;  %873 = vmatprep.subr.bf16.mxu1 %v1171_v1  ;;  %v993_v4 = vld [vmem:[#allocation4 + $0x4] ss:$8 sps:$4 sm:$0xff]   ;;  %v995_v5 = vld [vmem:[#allocation4] ss:$8 sps:$4 sm:$0xff]  }
  0x61   : > { %431 = vmatprep.subr.bf16.mxu0 %v990_v2  ;;  %v377_v6 = vld [vmem:[%s320_s16] sm:$0xff]  ;;  %vm415_vm0 = vcmask 261120   ;;  %v998_v10 = vld [vmem:[#allocation6 + $0x28] sm:$0xff]   ;;  %v999_v11 = vld [vmem:[#allocation6 + $0x20] sm:$0xff]   ;;  %vm1172_vm1 = vmmov 0   ;;  %v386_v23 = vshrl.u32 %v385_v22, 7 }
  0x62   : > { %432 = vmatpush1.bf16.msra.mxu0 %v992_v3  ;;  %v996_v7 = vld [vmem:[#allocation6 + $0x38] sm:$0xff]   ;;  %v997_v8 = vld [vmem:[#allocation6 + $0x30] sm:$0xff]   ;;  %v378_v9 = vpack.c.bf16 %v377_v6, %v377_v6  ;;  %v1002_v14 = vld [vmem:[#allocation6 + $0x8] sm:$0xff]   ;;  %889 = vmatprep.mubr.msk.bf16.mxu1 %vm1172_vm1, %v1171_v1  ;;  %p368_p9 = scmp.lt.s32.totalorder %s1237_s9, 1 }
  0x63   : > { %433 = vmatprep.subr.bf16.mxu0 %v993_v4  ;;  %874 = vmatpush3.bf16.msra.mxu1 %v996_v7  ;;  %v1000_v12 = vld [vmem:[#allocation6 + $0x18] sm:$0xff]   ;;  %v1001_v13 = vld [vmem:[#allocation6 + $0x10] sm:$0xff]   ;;  %v1003_v15 = vld [vmem:[#allocation6] sm:$0xff]   ;;  %v387_v24 = vsub.s32 0, %v386_v23  ;;  %v391_v26 = vsub.s32 1, %v386_v23 }
  0x64   : > { %875 = vmatprep.subr.bf16.mxu1 %v1171_v1  ;;  %v1004_v16 = vld [vmem:[#allocation7 + $0x38] sm:$0xff]   ;;  %v1005_v17 = vld [vmem:[#allocation7 + $0x30] sm:$0xff]   ;;  %v1006_v18 = vld [vmem:[#allocation7 + $0x28] sm:$0xff]   ;;  %s1418_s9 = smov (!%p368_p9, %s1237_s9), 1 }
  0x65   : > { %v1007_v19 = vld [vmem:[#allocation7 + $0x20] sm:$0xff]   ;;  %v1008_v20 = vld [vmem:[#allocation7 + $0x18] sm:$0xff]   ;;  %v1009_v21 = vld [vmem:[#allocation7 + $0x10] sm:$0xff]   ;;  %s828_s27 = sshll.u32 %s1418_s9, 3 }
  0x66   : > { %434 = vmatpush1.bf16.msra.mxu0 %v995_v5  ;;  %v383_v25 = vld [vmem:[%s1393_s2] sm:$0x3]  ;;  %s375_s15 = scalar_lea.vmem %s1399_s8, %s828_s27  ;;  %v1010_v38 = vld [vmem:[#allocation7 + $0x8] sm:$0xff]   ;;  %v1011_v39 = vld [vmem:[#allocation7] sm:$0xff]   ;;  %s371_s25 = scalar_lea.vmem %s1398_s7, %s828_s27 }
  0x67   : > { %893 = vmatprep.subr.bf16.mxu0 %v1171_v1  ;;  %876 = vmatpush3.bf16.msra.mxu1 %v997_v8  ;;  %v388_v27 = vrot.slane %v383_v25, %v387_v24  ;;  %v392_v28 = vrot.slane %v383_v25, %v391_v26  ;;  %v835_v40 = vld [vmem:[%s1395_s4] ss:$0 sm:$0xff] }
  0x68   : > { %877 = vmatprep.subr.bf16.mxu1 %v1171_v1  ;;  %v844_v48 = vld [vmem:[%s1397_s6] ss:$0 sm:$0xff] }
  0x69   : > { %834 = vmatmul.mubr.msk.bf16.vlgmr.msra.gmra.mxu0 %vm415_vm0, %v378_v9 }
  0x6a   : > { %909 = vmatprep.mubr.msk.bf16.mxu0 %vm1172_vm1, %v1171_v1  ;;  %894 = vmatpush3.bf16.msra.mxu0 %v1004_v16 }
  0x6b   : > { %878 = vmatpush3.bf16.msra.mxu1 %v998_v10  ;;  %895 = vmatprep.subr.bf16.mxu0 %v1171_v1 }
  0x6c   : > { %879 = vmatprep.subr.bf16.mxu1 %v1171_v1 }
  0x6e   : > { %896 = vmatpush3.bf16.msra.mxu0 %v1005_v17 }
  0x6f   : > { %880 = vmatpush3.bf16.msra.mxu1 %v999_v11  ;;  %897 = vmatprep.subr.bf16.mxu0 %v1171_v1 }
  0x70   : > { %881 = vmatprep.subr.bf16.mxu1 %v1171_v1 }
  0x72   : > { %898 = vmatpush3.bf16.msra.mxu0 %v1006_v18 }
  0x73   : > { %882 = vmatpush3.bf16.msra.mxu1 %v1000_v12  ;;  %899 = vmatprep.subr.bf16.mxu0 %v1171_v1 }
  0x74   : > { %883 = vmatprep.subr.bf16.mxu1 %v1171_v1 }
  0x76   : > { %900 = vmatpush3.bf16.msra.mxu0 %v1007_v19 }
  0x77   : > { %884 = vmatpush3.bf16.msra.mxu1 %v1001_v13  ;;  %901 = vmatprep.subr.bf16.mxu0 %v1171_v1 }
  0x78   : > { %885 = vmatprep.subr.bf16.mxu1 %v1171_v1 }
  0x7a   : > { %902 = vmatpush3.bf16.msra.mxu0 %v1008_v20 }
  0x7b   : > { %886 = vmatpush3.bf16.msra.mxu1 %v1002_v14  ;;  %903 = vmatprep.subr.bf16.mxu0 %v1171_v1 }
  0x7c   : > { %887 = vmatprep.subr.bf16.mxu1 %v1171_v1 }
  0x7e   : > { %904 = vmatpush3.bf16.msra.mxu0 %v1009_v21 }
  0x7f   : > { %888 = vmatpush3.bf16.msra.mxu1 %v1003_v15  ;;  %905 = vmatprep.subr.bf16.mxu0 %v1171_v1 }
  0x82   : > { %906 = vmatpush3.bf16.msra.mxu0 %v1010_v38 }
  0x83   : > { %907 = vmatprep.subr.bf16.mxu0 %v1171_v1 }
  0x86   : > { %908 = vmatpush3.bf16.msra.mxu0 %v1011_v39 }
 0x129   : > { %v453_v29 = vpop.f32.mrf.mxu0 }
 0x12a   : > { %v454_v30 = vadd.f32 %v453_v29, %v388_v27 }
 0x12b   : > { %v455_v31 = vpop.f32.mrf.mxu0 }
 0x12c   : > { %v460_v32 = vmax.f32 %v454_v30, 0.0  ;;  %v456_v33 = vadd.f32 %v455_v31, %v392_v28 }
 0x12d   : > { %v457_v34 = vpop.f32.mrf.mxu0 }
 0x12e   : > { %v462_v35 = vpack.c.bf16 %v460_v32, %v460_v32  ;;  %v461_v36 = vmax.f32 %v456_v33, 0.0 }
 0x12f   : > { %v458_v37 = vpop.f32.mrf.mxu0 }
 0x130   : > { %689 = vst [vmem:[%s375_s15] sm:$0xff] %v461_v36  ;;  %890 = vmatmul.mubr.bf16.vlgmr.msra.gmra.mxu1 %v462_v35 }
 0x1f0   : > { %v568_v41 = vpop.f32.mrf.mxu1 }
 0x1f1   : > { %v569_v42 = vadd.f32 %v835_v40, %v568_v41 }
 0x1f2   : > { %v891_v43 = vpop.f32.mrf.mxu1 }
 0x1f3   : > { %v574_v44 = vmax.f32 %v569_v42, 0.0 }
 0x1f4   : > { %v571_v45 = vpop.f32.mrf.mxu1 }
 0x1f5   : > { %v575_v46 = vpack.c.bf16 %v574_v44, %v574_v44 }
 0x1f6   : > { %v892_v47 = vpop.f32.mrf.mxu1 }
 0x1f7   : > { %910 = vmatmul.mubr.bf16.vlgmr.msra.gmra.mxu0 %v575_v46 }
 0x2b7   : > { %v681_v49 = vpop.f32.mrf.mxu0 }
 0x2b8   : > { %v682_v50 = vadd.f32 %v844_v48, %v681_v49 }
 0x2b9   : > { %v911_v51 = vpop.f32.mrf.mxu0 }
 0x2ba   : > { %v687_v52 = vmax.f32 %v682_v50, 0.0 }
 0x2bb   : > { %v684_v53 = vpop.f32.mrf.mxu0 }
 0x2bc   : > { %688 = vst [vmem:[%s371_s25] sm:$0xff] %v687_v52 }
 0x2bd   : > { %v912_v54 = vpop.f32.mrf.mxu0 }
 0x2be PF: > { %p21_p8 = scmp.ge.s32.totalorder %s1280_s13, 4   ;;  %s1413_s27 = smov %s1152_s28 }
 0x2bf   : > { %s1414_s28 = smov %s1156_s29  ;;  %s1415_s29 = smov %s1298_s14 }
 0x2c0   : > { %s1416_s30 = smov %s1280_s13  ;;  %23 = sbr.rel (!%p21_p8) target bundleno = 5 (0x5), region = 112 }
 0x2c5   :  { %723 = vsyncpa [#allocation3], 1 }
 0x2c6   :  { %725 = vsyncpa [#allocation3 + $0x1], 1 }
 0x2c7   :  { %726 = vsyncpa [#allocation5], 1 }
 0x2c8   :  { %727 = vsyncpa [#allocation8], 1 }

// kernel: pre_embedded_graph_decoder.1
= control target key start
LH: loop header
LB: loop body
LE: loop exit
PB: predicated region body
PF: predicated region fallthrough
CT: control target
= control target key end

     0   :  { %14 = vsyncpa [#allocation3], 0  ;;  %s1391_s0 = inlined_call_operand.hbm [shape: f32[16,32], index: 0, kind: input, shape index: {}]   ;;  %s1392_s1 = inlined_call_operand.hbm [shape: bf16[32,256], index: 1, kind: input, shape index: {}]   ;;  %s1393_s2 = inlined_call_operand.vmem [shape: f32[1,256], index: 2, kind: input, shape index: {}]   ;;  %s1394_s3 = inlined_call_operand.hbm [shape: bf16[128,128], index: 3, kind: input, shape index: {}]   ;;  %s1395_s4 = inlined_call_operand.vmem [shape: f32[1,128], index: 4, kind: input, shape index: {}]   ;;  %s1396_s5 = inlined_call_operand.hbm [shape: bf16[128,128], index: 5, kind: input, shape index: {}]   ;;  %s1397_s6 = inlined_call_operand.vmem [shape: f32[1,128], index: 6, kind: input, shape index: {}]   ;;  %s1398_s7 = inlined_call_operand.vmem [shape: f32[16,128], index: 7, kind: output, shape index: {0}]   ;;  %s1399_s8 = inlined_call_operand.vmem [shape: f32[16,128], index: 8, kind: output, shape index: {1}]  }
   0x1   :  { %16 = vsyncpa [#allocation3 + $0x1], 0 }
   0x2   :  { %17 = vsyncpa [#allocation5], 0 }
   0x3   :  { %18 = vsyncpa [#allocation8], 0  ;;  %s1218_s27 = smov 0   ;;  %s1220_s28 = smov 0  }
   0x4   :  { %s1222_s29 = smov 0   ;;  %s1224_s30 = smov 0  }
   0x5 LB: > { %s1237_s9 = sadd.s32 4294967295, %s1160_s30   ;;  %p44_p0 = scmp.ne.s32.totalorder %s1152_s28, %s1148_s27  ;;  %s1160_s30 = sphi %s1224_s30, %s1416_s30   ;;  %s1156_s29 = sphi %s1222_s29, %s1415_s29   ;;  %s1152_s28 = sphi %s1220_s28, %s1414_s28   ;;  %s1148_s27 = sphi %s1218_s27, %s1413_s27  }
   0x6   : > { %p1400_p1 = scmp.eq.s32.totalorder %s1237_s9, 0  ;;  %p816_p2 = scmp.ge.s32.totalorder %s1160_s30, 1 }
   0x7   : > { %p233_p3 = scmp.lt.s32.totalorder %s1160_s30, 3  ;;  %s1162_s12 = smov [#allocation4]  }
   0x8   : > { %p1245_p4 = por %p1400_p1, %p44_p0  ;;  %s245_s13 = sshll.u32 %s1162_s12, 4  ;;  %s246_s13 = int_to_ptr.vmem [resolvable:$true] %s245_s13 }
   0x9   : > { %p1249_p5 = pnand %p816_p2, %p233_p3  ;;  %s1163_s15 = smov [#allocation6]  }
   0xa   : > { %s1403_s10 = scalar_select %p1245_p4, 1, 0 }
   0xb   : > { %s1404_s11 = scalar_select %p1249_p5, 1, 0 }
   0xc   : > { %p927_p6 = pneg %p1249_p5  ;;  %s261_s16 = sshll.u32 %s1163_s15, 4  ;;  %s262_s16 = int_to_ptr.vmem [resolvable:$true] %s261_s16 }
   0xd   : > { %s1023_s17 = scalar_lea.vmem %s246_s13, 512  ;;  %p1031_p12 = scmp.lt.s32.totalorder %s246_s13, %s246_s13 }
   0xe   : > { %p1257_p7 = pnand %p927_p6, %p1400_p1  ;;  %p1024_p9 = scmp.ne.s32.totalorder %s246_s13, %s1023_s17 }
   0xf   : > { %p1032_p13 = scmp.lt.s32.totalorder %s1023_s17, %s1023_s17 }
  0x10   : > { %p1014_p8 = pneg %p1257_p7 }
  0x11   : > { %p1033_p0 = por %p1032_p13, %p1031_p12 }
  0x12   : > { %p1026_p10 = pnand %p1024_p9, %p1014_p8 }
  0x14   : > { %p1027_p11 = pneg %p1026_p10 }
  0x16   : > { %p1034_p2 = pnand %p1033_p0, %p1027_p11 }
  0x18   : > { %1037 = shalt.err (!%p1034_p2)
}
  0x19   : > { %s1164_s18 = smov 128   ;;  %s1165_s19 = smov 8  }
  0x1a   : > { %930 = dma.hbm_to_vmem [thread:$0]  (!%p1257_p7), %s1392_s1, 512, %s246_s13, [#allocation5], %s1164_s18, %s1164_s18, %s1165_s19  }
  0x1b   : > { %s1049_s22 = scalar_lea.vmem %s262_s16, 1024  ;;  %p1057_p10 = scmp.lt.s32.totalorder %s262_s16, %s262_s16 }
  0x1c   : > { %p1050_p3 = scmp.ne.s32.totalorder %s262_s16, %s1049_s22  ;;  %p1058_p1 = scmp.lt.s32.totalorder %s1049_s22, %s1049_s22 }
  0x1e   : > { %p1052_p6 = pnand %p1050_p3, %p1014_p8  ;;  %p1059_p12 = por %p1058_p1, %p1057_p10 }
  0x20   : > { %p1053_p9 = pneg %p1052_p6 }
  0x22   : > { %p1060_p11 = pnand %p1059_p12, %p1053_p9 }
  0x24   : > { %1063 = shalt.err (!%p1060_p11)
}
  0x25   : > { %s1166_s23 = smov 64   ;;  %s1167_s24 = smov 4  }
  0x26   : > { %933 = dma.hbm_to_vmem [thread:$0]  (!%p1257_p7), %s1394_s3, 1024, %s262_s16, [#allocation5], %s1166_s23, %s1166_s23, %s1167_s24  }
  0x27   : > { %s1168_s27 = smov [#allocation7]   ;;  %s1280_s13 = sadd.s32 1, %s1160_s30  }
  0x28   : > { %s277_s12 = sshll.u32 %s1168_s27, 4  ;;  %s278_s12 = int_to_ptr.vmem [resolvable:$true] %s277_s12 }
  0x29   : > { %s1075_s15 = scalar_lea.vmem %s278_s12, 1024  ;;  %p1083_p2 = scmp.lt.s32.totalorder %s278_s12, %s278_s12 }
  0x2a   : > { %p1076_p13 = scmp.ne.s32.totalorder %s278_s12, %s1075_s15  ;;  %p1084_p3 = scmp.lt.s32.totalorder %s1075_s15, %s1075_s15 }
  0x2c   : > { %p1078_p1 = pnand %p1076_p13, %p1014_p8  ;;  %p1085_p6 = por %p1084_p3, %p1083_p2 }
  0x2e   : > { %p1079_p0 = pneg %p1078_p1 }
  0x30   : > { %p1086_p9 = pnand %p1085_p6, %p1079_p0 }
  0x32   : > { %1089 = shalt.err (!%p1086_p9)
}
  0x33   : > { %936 = dma.hbm_to_vmem [thread:$0]  (!%p1257_p7), %s1396_s5, 1024, %s278_s12, [#allocation8], %s1166_s23, %s1166_s23, %s1167_s24  }
  0x34   : > { %s28_s18 = ssub.s32 %s1160_s30, %s1280_s13  ;;  %s31_s19 = sadd.s32 1, %s1156_s29 }
  0x35   : > { %p29_p8 = scmp.eq.s32.totalorder %s28_s18, 0  ;;  %p38_p10 = scmp.ne.s32.totalorder %s1156_s29, %s1152_s28 }
  0x36   : > { %p39_p12 = scmp.eq.s32.totalorder %s1160_s30, 0  ;;  %p944_p11 = scmp.lt.s32.totalorder %s1160_s30, 2 }
  0x37   : > { %s1298_s14 = scalar_select %p29_p8, %s1156_s29, %s31_s19  }
  0x38   : > { %p40_p13 = por %p39_p12, %p38_p10  ;;  %s294_s20 = sand.u32 1, %s1156_s29  }
  0x39   : > { %s821_s21 = sshll.u32 %s294_s20, 3  ;;  %s822_s22 = sshll.u32 %s1160_s30, 7 }
  0x3a   : > { %s1305_s27 = scalar_lea.hbm %s1391_s0, %s822_s22  ;;  %s298_s23 = scalar_lea.vmem [#allocation2], %s821_s21 }
  0x3b   : > { %s305_s24 = sshll.u32 %s298_s23, 4  ;;  %p1307_p7 = pnand %p944_p11, %p40_p13  ;;  %s306_s24 = int_to_ptr.vmem [resolvable:$true] %s305_s24 }
  0x3c   : > { %s295_s15 = scalar_lea.sflag [#allocation3], %s294_s20  ;;  %s1090_s17 = scalar_lea.hbm %s1305_s27, 128 }
  0x3d   : > { %p1091_p1 = scmp.ne.s32.totalorder %s1305_s27, %s1090_s17  ;;  %p1092_p0 = pneg %p1307_p7 }
  0x3e   : > { %s1095_s18 = scalar_lea.hbm %s1391_s0, 256  ;;  %p1096_p6 = scmp.lt.s32.totalorder %s1305_s27, %s1391_s0 }
  0x3f   : > { %p1093_p2 = pnand %p1092_p0, %p1091_p1  ;;  %p1097_p9 = scmp.lt.s32.totalorder %s1095_s18, %s1090_s17 }
  0x41   : > { %p1094_p3 = pneg %p1093_p2  ;;  %p1098_p8 = por %p1097_p9, %p1096_p6 }
  0x43   : > { %p1099_p10 = pnand %p1098_p8, %p1094_p3 }
  0x45   : > { %1102 = shalt.err (!%p1099_p10)
}
  0x46   : > { %s1103_s22 = scalar_lea.vmem %s306_s24, 128  ;;  %s1169_s20 = smov [#allocation2]  }
  0x47   : > { %p1104_p12 = scmp.ne.s32.totalorder %s306_s24, %s1103_s22  ;;  %s1108_s25 = sshll.u32 %s1169_s20, 4  ;;  %s1109_s25 = int_to_ptr.vmem [resolvable:$false] %s1108_s25 }
  0x48   : > { %s1110_s26 = scalar_lea.vmem %s1109_s25, 256  ;;  %p1111_p1 = scmp.lt.s32.totalorder %s306_s24, %s1109_s25 }
  0x49   : > { %p1106_p11 = pnand %p1104_p12, %p1092_p0  ;;  %p1112_p2 = scmp.lt.s32.totalorder %s1110_s26, %s1103_s22 }
  0x4b   : > { %p1107_p13 = pneg %p1106_p11  ;;  %p1113_p4 = por %p1112_p2, %p1111_p1 }
  0x4d   : > { %p1114_p5 = pnand %p1113_p4, %p1107_p13 }
  0x4f   : > { %1117 = shalt.err (!%p1114_p5)
}
  0x50   : > { %940 = dma.hbm_to_vmem [thread:$0]  (!%p1307_p7), %s1305_s27, 128, %s306_s24, %s295_s15  }
  0x51   : > { %p1407_p3 = scmp.ne.s32.totalorder %s1404_s11, 0 }
  0x52   : > { %s316_s23 = sand.u32 (!%p1407_p3), 1, %s1152_s28   ;;  %p1408_p0 = scmp.ne.s32.totalorder (!%p1407_p3), %s1403_s10, 0 }
  0x53   : > { %314 = sbr.rel (%p1407_p3) target bundleno = 702 (0x2be), region = 48  ;;  %s824_s17 = sshll.u32 (!%p1407_p3), %s316_s23, 3 }
  0x54   : > { %s317_s30 = scalar_lea.sflag (!%p1407_p3), [#allocation3], %s316_s23  ;;  %s320_s16 = scalar_lea.vmem (!%p1407_p3), [#allocation2], %s824_s17 }
  0x58   : > { %1135 = dma.done.wait (%p1408_p0), %s317_s30, 128  }
  0x59   : > { %1137 = vsyncadd (%p1408_p0), %s317_s30, 4294967168  ;;  %p1409_p4 = scmp.eq.s32.totalorder %s1237_s9, 0 }
  0x5b   : > { %1139 = dma.done.wait (%p1409_p4), [#allocation5], 1536   ;;  %p1410_p5 = pmov %p1409_p4 }
  0x5c   : > { %p1411_p7 = pmov %p1409_p4 }
  0x5d   : > { %1141 = vsyncadd (%p1410_p5), [#allocation5], 4294965760 }
  0x5e   : > { %1143 = dma.done.wait (%p1411_p7), [#allocation8], 1024   ;;  %p1412_p6 = pmov %p1409_p4 }
  0x5f   : > { %v1170_v0 = vmov 0   ;;  %v1171_v1 = vmov 0.0   ;;  %v990_v2 = vld [vmem:[#allocation4 + $0x14] ss:$8 sps:$4 sm:$0xff]   ;;  %v992_v3 = vld [vmem:[#allocation4 + $0x10] ss:$8 sps:$4 sm:$0xff]   ;;  %v385_v22 = vlaneseq }
  0x60   : > { %1145 = vsyncadd (%p1412_p6), [#allocation8], 4294966272  ;;  %451 = vmatprep.mubr.bf16.mxu0 %v1170_v0  ;;  %873 = vmatprep.subr.bf16.mxu1 %v1171_v1  ;;  %v993_v4 = vld [vmem:[#allocation4 + $0x4] ss:$8 sps:$4 sm:$0xff]   ;;  %v995_v5 = vld [vmem:[#allocation4] ss:$8 sps:$4 sm:$0xff]  }
  0x61   : > { %431 = vmatprep.subr.bf16.mxu0 %v990_v2  ;;  %v377_v6 = vld [vmem:[%s320_s16] sm:$0xff]  ;;  %vm415_vm0 = vcmask 261120   ;;  %v998_v10 = vld [vmem:[#allocation6 + $0x28] sm:$0xff]   ;;  %v999_v11 = vld [vmem:[#allocation6 + $0x20] sm:$0xff]   ;;  %vm1172_vm1 = vmmov 0   ;;  %v386_v23 = vshrl.u32 %v385_v22, 7 }
  0x62   : > { %432 = vmatpush1.bf16.msra.mxu0 %v992_v3  ;;  %v996_v7 = vld [vmem:[#allocation6 + $0x38] sm:$0xff]   ;;  %v997_v8 = vld [vmem:[#allocation6 + $0x30] sm:$0xff]   ;;  %v378_v9 = vpack.c.bf16 %v377_v6, %v377_v6  ;;  %v1002_v14 = vld [vmem:[#allocation6 + $0x8] sm:$0xff]   ;;  %889 = vmatprep.mubr.msk.bf16.mxu1 %vm1172_vm1, %v1171_v1  ;;  %p368_p9 = scmp.lt.s32.totalorder %s1237_s9, 1 }
  0x63   : > { %433 = vmatprep.subr.bf16.mxu0 %v993_v4  ;;  %874 = vmatpush3.bf16.msra.mxu1 %v996_v7  ;;  %v1000_v12 = vld [vmem:[#allocation6 + $0x18] sm:$0xff]   ;;  %v1001_v13 = vld [vmem:[#allocation6 + $0x10] sm:$0xff]   ;;  %v1003_v15 = vld [vmem:[#allocation6] sm:$0xff]   ;;  %v387_v24 = vsub.s32 0, %v386_v23  ;;  %v391_v26 = vsub.s32 1, %v386_v23 }
  0x64   : > { %875 = vmatprep.subr.bf16.mxu1 %v1171_v1  ;;  %v1004_v16 = vld [vmem:[#allocation7 + $0x38] sm:$0xff]   ;;  %v1005_v17 = vld [vmem:[#allocation7 + $0x30] sm:$0xff]   ;;  %v1006_v18 = vld [vmem:[#allocation7 + $0x28] sm:$0xff]   ;;  %s1418_s9 = smov (!%p368_p9, %s1237_s9), 1 }
  0x65   : > { %v1007_v19 = vld [vmem:[#allocation7 + $0x20] sm:$0xff]   ;;  %v1008_v20 = vld [vmem:[#allocation7 + $0x18] sm:$0xff]   ;;  %v1009_v21 = vld [vmem:[#allocation7 + $0x10] sm:$0xff]   ;;  %s828_s27 = sshll.u32 %s1418_s9, 3 }
  0x66   : > { %434 = vmatpush1.bf16.msra.mxu0 %v995_v5  ;;  %v383_v25 = vld [vmem:[%s1393_s2] sm:$0x3]  ;;  %s375_s15 = scalar_lea.vmem %s1399_s8, %s828_s27  ;;  %v1010_v38 = vld [vmem:[#allocation7 + $0x8] sm:$0xff]   ;;  %v1011_v39 = vld [vmem:[#allocation7] sm:$0xff]   ;;  %s371_s25 = scalar_lea.vmem %s1398_s7, %s828_s27 }
  0x67   : > { %893 = vmatprep.subr.bf16.mxu0 %v1171_v1  ;;  %876 = vmatpush3.bf16.msra.mxu1 %v997_v8  ;;  %v388_v27 = vrot.slane %v383_v25, %v387_v24  ;;  %v392_v28 = vrot.slane %v383_v25, %v391_v26  ;;  %v835_v40 = vld [vmem:[%s1395_s4] ss:$0 sm:$0xff] }
  0x68   : > { %877 = vmatprep.subr.bf16.mxu1 %v1171_v1  ;;  %v844_v48 = vld [vmem:[%s1397_s6] ss:$0 sm:$0xff] }
  0x69   : > { %834 = vmatmul.mubr.msk.bf16.vlgmr.msra.gmra.mxu0 %vm415_vm0, %v378_v9 }
  0x6a   : > { %909 = vmatprep.mubr.msk.bf16.mxu0 %vm1172_vm1, %v1171_v1  ;;  %894 = vmatpush3.bf16.msra.mxu0 %v1004_v16 }
  0x6b   : > { %878 = vmatpush3.bf16.msra.mxu1 %v998_v10  ;;  %895 = vmatprep.subr.bf16.mxu0 %v1171_v1 }
  0x6c   : > { %879 = vmatprep.subr.bf16.mxu1 %v1171_v1 }
  0x6e   : > { %896 = vmatpush3.bf16.msra.mxu0 %v1005_v17 }
  0x6f   : > { %880 = vmatpush3.bf16.msra.mxu1 %v999_v11  ;;  %897 = vmatprep.subr.bf16.mxu0 %v1171_v1 }
  0x70   : > { %881 = vmatprep.subr.bf16.mxu1 %v1171_v1 }
  0x72   : > { %898 = vmatpush3.bf16.msra.mxu0 %v1006_v18 }
  0x73   : > { %882 = vmatpush3.bf16.msra.mxu1 %v1000_v12  ;;  %899 = vmatprep.subr.bf16.mxu0 %v1171_v1 }
  0x74   : > { %883 = vmatprep.subr.bf16.mxu1 %v1171_v1 }
  0x76   : > { %900 = vmatpush3.bf16.msra.mxu0 %v1007_v19 }
  0x77   : > { %884 = vmatpush3.bf16.msra.mxu1 %v1001_v13  ;;  %901 = vmatprep.subr.bf16.mxu0 %v1171_v1 }
  0x78   : > { %885 = vmatprep.subr.bf16.mxu1 %v1171_v1 }
  0x7a   : > { %902 = vmatpush3.bf16.msra.mxu0 %v1008_v20 }
  0x7b   : > { %886 = vmatpush3.bf16.msra.mxu1 %v1002_v14  ;;  %903 = vmatprep.subr.bf16.mxu0 %v1171_v1 }
  0x7c   : > { %887 = vmatprep.subr.bf16.mxu1 %v1171_v1 }
  0x7e   : > { %904 = vmatpush3.bf16.msra.mxu0 %v1009_v21 }
  0x7f   : > { %888 = vmatpush3.bf16.msra.mxu1 %v1003_v15  ;;  %905 = vmatprep.subr.bf16.mxu0 %v1171_v1 }
  0x82   : > { %906 = vmatpush3.bf16.msra.mxu0 %v1010_v38 }
  0x83   : > { %907 = vmatprep.subr.bf16.mxu0 %v1171_v1 }
  0x86   : > { %908 = vmatpush3.bf16.msra.mxu0 %v1011_v39 }
 0x129   : > { %v453_v29 = vpop.f32.mrf.mxu0 }
 0x12a   : > { %v454_v30 = vadd.f32 %v453_v29, %v388_v27 }
 0x12b   : > { %v455_v31 = vpop.f32.mrf.mxu0 }
 0x12c   : > { %v460_v32 = vmax.f32 %v454_v30, 0.0  ;;  %v456_v33 = vadd.f32 %v455_v31, %v392_v28 }
 0x12d   : > { %v457_v34 = vpop.f32.mrf.mxu0 }
 0x12e   : > { %v462_v35 = vpack.c.bf16 %v460_v32, %v460_v32  ;;  %v461_v36 = vmax.f32 %v456_v33, 0.0 }
 0x12f   : > { %v458_v37 = vpop.f32.mrf.mxu0 }
 0x130   : > { %689 = vst [vmem:[%s375_s15] sm:$0xff] %v461_v36  ;;  %890 = vmatmul.mubr.bf16.vlgmr.msra.gmra.mxu1 %v462_v35 }
 0x1f0   : > { %v568_v41 = vpop.f32.mrf.mxu1 }
 0x1f1   : > { %v569_v42 = vadd.f32 %v835_v40, %v568_v41 }
 0x1f2   : > { %v891_v43 = vpop.f32.mrf.mxu1 }
 0x1f3   : > { %v574_v44 = vmax.f32 %v569_v42, 0.0 }
 0x1f4   : > { %v571_v45 = vpop.f32.mrf.mxu1 }
 0x1f5   : > { %v575_v46 = vpack.c.bf16 %v574_v44, %v574_v44 }
 0x1f6   : > { %v892_v47 = vpop.f32.mrf.mxu1 }
 0x1f7   : > { %910 = vmatmul.mubr.bf16.vlgmr.msra.gmra.mxu0 %v575_v46 }
 0x2b7   : > { %v681_v49 = vpop.f32.mrf.mxu0 }
 0x2b8   : > { %v682_v50 = vadd.f32 %v844_v48, %v681_v49 }
 0x2b9   : > { %v911_v51 = vpop.f32.mrf.mxu0 }
 0x2ba   : > { %v687_v52 = vmax.f32 %v682_v50, 0.0 }
 0x2bb   : > { %v684_v53 = vpop.f32.mrf.mxu0 }
 0x2bc   : > { %688 = vst [vmem:[%s371_s25] sm:$0xff] %v687_v52 }
 0x2bd   : > { %v912_v54 = vpop.f32.mrf.mxu0 }
 0x2be PF: > { %p21_p8 = scmp.ge.s32.totalorder %s1280_s13, 4   ;;  %s1413_s27 = smov %s1152_s28 }
 0x2bf   : > { %s1414_s28 = smov %s1156_s29  ;;  %s1415_s29 = smov %s1298_s14 }
 0x2c0   : > { %s1416_s30 = smov %s1280_s13  ;;  %23 = sbr.rel (!%p21_p8) target bundleno = 5 (0x5), region = 112 }
 0x2c5   :  { %723 = vsyncpa [#allocation3], 1 }
 0x2c6   :  { %725 = vsyncpa [#allocation3 + $0x1], 1 }
 0x2c7   :  { %726 = vsyncpa [#allocation5], 1 }
 0x2c8   :  { %727 = vsyncpa [#allocation8], 1 }

</bundles_post_ra>
